<compile_context>
chip_gen: v7x
topology: tpu7x:2x2x1
jax: 0.10.0
libtpu: 0.0.40
codegen_flags: <defaults>
</compile_context>

<pallas_src>
import functools

import jax
import jax.numpy as jnp
from jax.experimental import pallas as pl
from jax.experimental.pallas import tpu as pltpu


def _lrn_kernel(x_ref, o_ref, *, local_size, alpha, beta):
    # x_ref / o_ref: (1, C, T) in VMEM.
    x = x_ref[...].astype(jnp.float32)
    sq = x * x
    c = x.shape[1]
    pad = (local_size - 1) // 2

    # Windowed sum over the channel (sublane) axis with zero padding at the
    # channel edges, via static sublane-shifted slices of a padded copy.
    if pad == 0:
        acc = sq
    else:
        zeros = jnp.zeros((1, pad, x.shape[2]), jnp.float32)
        sq_pad = jnp.concatenate([zeros, sq, zeros], axis=1)
        acc = sq_pad[:, 0:c, :]
        for off in range(1, local_size):
            acc = acc + sq_pad[:, off:off + c, :]

    # count_include_pad=True -> always divide by local_size.
    div = acc * jnp.float32(alpha / float(local_size)) + 1.0

    # out = x * div**(-beta)
    if beta == 0.75:
        r = jax.lax.rsqrt(div)          # div^-0.5
        inv = r * jnp.sqrt(r)           # div^-0.5 * div^-0.25 = div^-0.75
    elif beta == 0.5:
        inv = jax.lax.rsqrt(div)
    else:
        inv = jnp.exp(jnp.float32(-beta) * jnp.log(div))

    o_ref[...] = (x * inv).astype(o_ref.dtype)


def lrn_pallas(x, local_size=1, alpha=1.0, beta=0.75):
    """LRN across channels. x: (N, C, H, W). Requires odd local_size."""
    assert local_size % 2 == 1, (
        "lrn_pallas only supports odd local_size (shape-preserving "
        "AvgPool3d padding)")
    N, C, H, W = x.shape
    HW = H * W
    x2 = x.reshape(N, C, HW)

    # Lane tile: a multiple of 128, capped to keep VMEM per step modest.
    LANE = 128
    hw_128 = ((HW + LANE - 1) // LANE) * LANE
    T = min(hw_128, 2048)
    hw_pad = ((HW + T - 1) // T) * T
    if hw_pad != HW:
        # Zero padding is harmless: sq=0 -> div=1 -> out=0, sliced off below.
        x2 = jnp.pad(x2, ((0, 0), (0, 0), (0, hw_pad - HW)))
    num_t = hw_pad // T

    kernel = functools.partial(
        _lrn_kernel,
        local_size=local_size,
        alpha=float(alpha),
        beta=float(beta),
    )

    out = pl.pallas_call(
        kernel,
        out_shape=jax.ShapeDtypeStruct((N, C, hw_pad), x.dtype),
        grid_spec=pl.GridSpec(
            grid=(N, num_t),
            in_specs=[pl.BlockSpec((1, C, T), lambda n, t: (n, 0, t))],
            out_specs=pl.BlockSpec((1, C, T), lambda n, t: (n, 0, t)),
        ),
        compiler_params=pltpu.CompilerParams(
            dimension_semantics=("parallel", "parallel"),
        ),
    )(x2)

    if hw_pad != HW:
        out = out[:, :, :HW]
    return out.reshape(N, C, H, W)


def lrn_reference(x, local_size=1, alpha=1.0, beta=0.75):
    """Pure-JAX reference mirroring the PyTorch module (odd local_size)."""
    assert local_size % 2 == 1
    N, C, H, W = x.shape
    pad = (local_size - 1) // 2
    sq = x.astype(jnp.float32) ** 2
    sq_pad = jnp.pad(sq, ((0, 0), (pad, pad), (0, 0), (0, 0)))
    acc = jnp.zeros_like(sq)
    for off in range(local_size):
        acc = acc + sq_pad[:, off:off + C, :, :]
    div = (acc / float(local_size)) * alpha + 1.0
    div = div ** beta
    return (x / div).astype(x.dtype)


if __name__ == "__main__":
    key = jax.random.PRNGKey(0)

    # Small NCHW input consistent with the module's usage in oldalexnet.
    x = jax.random.normal(key, (2, 8, 16, 16), dtype=jnp.float32)

    # Config 1: module defaults (local_size=1, alpha=1.0, beta=0.75).
    out_default = lrn_pallas(x, local_size=1, alpha=1.0, beta=0.75)
    ref_default = lrn_reference(x, local_size=1, alpha=1.0, beta=0.75)

    # Config 2: AlexNet-style LRN (local_size=5, alpha=1e-4, beta=0.75).
    out_alex = lrn_pallas(x, local_size=5, alpha=1e-4, beta=0.75)
    ref_alex = lrn_reference(x, local_size=5, alpha=1e-4, beta=0.75)

    # Config 3: non-128-multiple spatial extent (exercises lane padding) and a
    # non-default beta (exercises the general exp/log epilogue path).
    x_odd = jax.random.normal(jax.random.PRNGKey(1), (2, 8, 5, 5),
                              dtype=jnp.float32)
    out_odd = lrn_pallas(x_odd, local_size=3, alpha=2.0, beta=0.6)
    ref_odd = lrn_reference(x_odd, local_size=3, alpha=2.0, beta=0.6)

    jax.block_until_ready((out_default, out_alex, out_odd))

    assert jnp.allclose(out_default, ref_default, atol=1e-5, rtol=1e-5)
    assert jnp.allclose(out_alex, ref_alex, atol=1e-5, rtol=1e-5)
    assert jnp.allclose(out_odd, ref_odd, atol=1e-5, rtol=1e-5)

    print("KERNEL_OK")
</pallas_src>

<mosaic_0001>
module attributes {stable_mosaic.version = 11 : i64} {
  func.func @_lrn_kernel(%arg0: i32, %arg1: i32, %arg2: memref<1x8x256xf32, #tpu.memory_space<vmem>>, %arg3: memref<1x8x256xf32, #tpu.memory_space<vmem>>) attributes {dimension_semantics = [#tpu.dimension_semantics<parallel>, #tpu.dimension_semantics<parallel>], iteration_bounds = array<i64: 2, 1>, scalar_prefetch = 0 : i64, scratch_operands = 0 : i64, tpu.core_type = #tpu.core_type<tc>, window_params = [{transform_indices = @transform_0, window_bounds = array<i64: 1, 8, 256>}, {transform_indices = @transform_1, window_bounds = array<i64: 1, 8, 256>}]} {
    %c0 = arith.constant 0 : index
    %c0_0 = arith.constant 0 : index
    %c0_1 = arith.constant 0 : index
    %0 = vector.load %arg2[%c0, %c0_0, %c0_1] : memref<1x8x256xf32, #tpu.memory_space<vmem>>, vector<1x8x256xf32>
    %1 = arith.mulf %0, %0 : vector<1x8x256xf32>
    %cst = arith.constant 1.000000e+00 : f32
    %2 = vector.broadcast %cst : f32 to vector<1x8x256xf32>
    %3 = arith.mulf %1, %2 : vector<1x8x256xf32>
    %cst_2 = arith.constant 1.000000e+00 : f32
    %4 = vector.broadcast %cst_2 : f32 to vector<1x8x256xf32>
    %5 = arith.addf %3, %4 : vector<1x8x256xf32>
    %6 = math.rsqrt %5 : vector<1x8x256xf32>
    %7 = math.sqrt %6 : vector<1x8x256xf32>
    %8 = arith.mulf %6, %7 : vector<1x8x256xf32>
    %9 = arith.mulf %0, %8 : vector<1x8x256xf32>
    %c0_3 = arith.constant 0 : index
    %c0_4 = arith.constant 0 : index
    %c0_5 = arith.constant 0 : index
    %10 = vector.load %arg3[%c0_3, %c0_4, %c0_5] : memref<1x8x256xf32, #tpu.memory_space<vmem>>, vector<1x8x256xf32>
    tpu.vector_store %arg3[%c0_3, %c0_4, %c0_5], %9 {strides = array<i32>} : memref<1x8x256xf32, #tpu.memory_space<vmem>>, vector<1x8x256xf32>,
    return
  }
  func.func @transform_0(%arg0: i32, %arg1: i32) -> (i32, i32, i32) {
    %c0_i32 = arith.constant 0 : i32
    %c0_i32_0 = arith.constant 0 : i32
    return %arg0, %c0_i32, %arg1 : i32, i32, i32
  }
  func.func @transform_1(%arg0: i32, %arg1: i32) -> (i32, i32, i32) {
    %c0_i32 = arith.constant 0 : i32
    %c0_i32_0 = arith.constant 0 : i32
    return %arg0, %c0_i32, %arg1 : i32, i32, i32
  }
}

</mosaic_0001>

<bundles_post_ra>
// kernel: tpu_custom_call.1
= control target key start
LH: loop header
LB: loop body
LE: loop exit
PB: predicated region body
PF: predicated region fallthrough
CT: control target
= control target key end

     0   :  { %6 = vsyncpa [#allocation3], 0  ;;  %s671_s0 = inlined_call_operand.hbm [shape: f32[2,8,256], index: 0, kind: input, shape index: {}]   ;;  %s672_s1 = inlined_call_operand.hbm [shape: f32[2,8,256], index: 1, kind: output, shape index: {}]  }
   0x1   :  { %8 = vsyncpa [#allocation3 + $0x1], 0 }
   0x2   :  { %9 = vsyncpa [#allocation4], 0 }
   0x3   :  { %11 = vsyncpa [#allocation4 + $0x1], 0  ;;  %s495_s6 = smov 0   ;;  %s497_s7 = smov 0  }
   0x4   :  { %s499_s8 = smov 0   ;;  %s501_s9 = smov 0  }
   0x5   :  { %s503_s10 = smov 0   ;;  %s505_s11 = smov 0  }
   0x6 LB: > { %s282_s12 = sadd.s32 4294967295, %s481_s11   ;;  %s283_s13 = sadd.s32 4294967294, %s481_s11   ;;  %s481_s11 = sphi %s505_s11, %s17_s11   ;;  %s477_s10 = sphi %s503_s10, %s688_s10   ;;  %s473_s9 = sphi %s501_s9, %s687_s9   ;;  %s469_s8 = sphi %s499_s8, %s686_s8   ;;  %s465_s7 = sphi %s497_s7, %s685_s7   ;;  %s461_s6 = sphi %s495_s6, %s684_s6  }
   0x7   : > { %s29_s14 = sadd.s32 1, %s477_s10  ;;  %s38_s15 = sadd.s32 1, %s469_s8 }
   0x8   : > { %p31_p0 = scmp.ge.s32.totalorder %s29_s14, 2  ;;  %p45_p1 = scmp.ne.s32.totalorder %s469_s8, %s465_s7 }
   0x9   : > { %p46_p2 = scmp.eq.s32.totalorder %s481_s11, 0  ;;  %p51_p3 = scmp.ne.s32.totalorder %s465_s7, %s461_s6 }
   0xa   : > { %s690_s14 = smov (%p31_p0, %s29_s14), 0  ;;  %p52_p5 = scmp.eq.s32.totalorder %s282_s12, 0 }
   0xb   : > { %p536_p4 = por %p46_p2, %p45_p1  ;;  %s33_s17 = ssub.s32 %s477_s10, %s690_s14 }
   0xc   : > { %p77_p6 = scmp.eq.s32.totalorder %s282_s12, 1  ;;  %p36_p7 = scmp.eq.s32.totalorder %s33_s17, 0 }
   0xd   : > { %p542_p8 = por %p52_p5, %p51_p3  ;;  %p83_p10 = scmp.eq.s32.totalorder %s283_s13, 1 }
   0xe   : > { %p546_p9 = por %p77_p6, %p45_p1  ;;  %p311_p13 = scmp.lt.s32.totalorder %s481_s11, 2 }
   0xf   : > { %s551_s20 = scalar_select %p36_p7, %s469_s8, %s38_s15  }
  0x10   : > { %s676_s19 = scalar_select %p546_p9, 1, 0 }
  0x11   : > { %p553_p11 = por %p83_p10, %p51_p3  ;;  %s103_s22 = sand.u32 1, %s469_s8  }
  0x12   : > { %s286_s23 = sshll.u32 %s103_s22, 4  ;;  %s297_s24 = sshll.u32 %s477_s10, 8 }
  0x13   : > { %s677_s21 = scalar_select %p553_p11, 1, 0 }
  0x14   : > { %s564_s27 = scalar_lea.hbm %s671_s0, %s297_s24  ;;  %s107_s28 = scalar_lea.vmem [#allocation2], %s286_s23 }
  0x15   : > { %s117_s29 = sshll.u32 %s107_s28, 4  ;;  %p570_p0 = pnand %p311_p13, %p536_p4  ;;  %s566_s29 = int_to_ptr.vmem [resolvable:$true] %s117_s29 }
  0x16   : > { %s104_s2 = scalar_lea.sflag [#allocation3], %s103_s22  ;;  %s369_s3 = scalar_lea.hbm %s564_s27, 256 }
  0x17   : > { %p370_p3 = scmp.ne.s32.totalorder %s564_s27, %s369_s3  ;;  %p371_p5 = pneg %p570_p0 }
  0x18   : > { %s374_s12 = scalar_lea.hbm %s671_s0, 512  ;;  %p375_p4 = scmp.lt.u32.totalorder %s564_s27, %s671_s0 }
  0x19   : > { %p372_p6 = pnand %p371_p5, %p370_p3  ;;  %p376_p10 = scmp.lt.u32.totalorder %s374_s12, %s369_s3 }
  0x1a   : > { %p378_p12 = scmp.lt.u32.totalorder %s369_s3, %s564_s27 }
  0x1b   : > { %p373_p7 = pneg %p372_p6  ;;  %p377_p13 = por %p376_p10, %p375_p4 }
  0x1d   : > { %p379_p1 = por %p378_p12, %p377_p13 }
  0x1f   : > { %p380_p2 = pnand %p379_p1, %p373_p7 }
  0x21   : > { %383 = shalt.err (!%p380_p2)
}
  0x22   : > { %s384_s16 = scalar_lea.vmem %s566_s29, 256  ;;  %s483_s17 = smov [#allocation2]  }
  0x23   : > { %p385_p3 = scmp.ne.s32.totalorder %s566_s29, %s384_s16  ;;  %s389_s22 = sshll.u32 %s483_s17, 4  ;;  %s390_s22 = int_to_ptr.vmem [resolvable:$false] %s389_s22 }
  0x24   : > { %s391_s23 = scalar_lea.vmem %s390_s22, 512  ;;  %p392_p9 = scmp.lt.s32.totalorder %s566_s29, %s390_s22 }
  0x25   : > { %p387_p6 = pnand %p385_p3, %p371_p5  ;;  %p393_p4 = scmp.lt.s32.totalorder %s391_s23, %s384_s16 }
  0x27   : > { %p388_p11 = pneg %p387_p6  ;;  %p394_p10 = por %p393_p4, %p392_p9 }
  0x29   : > { %p395_p12 = pnand %p394_p10, %p388_p11 }
  0x2b   : > { %398 = shalt.err (!%p395_p12)
}
  0x2c   : > { %306 = dma.hbm_to_vmem [thread:$0]  (!%p570_p0), %s564_s27, 256, %s566_s29, %s104_s2  }
  0x2d   : > { %p679_p1 = scmp.lt.s32.totalorder %s481_s11, 3  ;;  %p680_p2 = scmp.ge.s32.totalorder %s481_s11, 1 }
  0x2f   : > { %p123_p5 = pnand %p680_p2, %p679_p1 }
  0x30   : > { %s606_s24 = sand.u32 (!%p123_p5), 1, %s465_s7  }
  0x31   : > { %126 = sbr.rel (%p123_p5) target bundleno = 107 (0x6b), region = 24  ;;  %s290_s25 = sshll.u32 (!%p123_p5), %s606_s24, 4 }
  0x32   : > { %s129_s26 = scalar_lea.sflag (!%p123_p5), [#allocation3], %s606_s24  ;;  %s132_s28 = scalar_lea.vmem (!%p123_p5), [#allocation2], %s290_s25 }
  0x38   : > { %452 = dma.done.wait (%p542_p8), %s129_s26, 256  }
  0x39   : > { %454 = vsyncadd (%p542_p8), %s129_s26, 4294967040  ;;  %v153_v0 = vld [vmem:[%s132_s28] sm:$0xff]  ;;  %v154_v1 = vld [vmem:[%s132_s28 + $0x8] sm:$0xff]  ;;  %s150_s18 = scalar_lea.vmem [#allocation5], %s290_s25  ;;  %s298_s29 = sshll.u32 %s473_s9, 8 }
  0x3a   : > { %v155_v2 = vmul.f32 %v153_v0, %v153_v0  ;;  %v156_v3 = vmul.f32 %v154_v1, %v154_v1  ;;  %s198_s27 = sshll.u32 %s150_s18, 4  ;;  %s624_s3 = scalar_lea.hbm %s672_s1, %s298_s29  ;;  %s619_s27 = int_to_ptr.vmem [resolvable:$true] %s198_s27 }
  0x3b   : > { %s182_s4 = scalar_lea.sflag [#allocation4], %s606_s24  ;;  %s399_s5 = scalar_lea.vmem %s619_s27, 256 }
  0x3c   : > { %v157_v4 = vadd.f32 1.0, %v155_v2  ;;  %v158_v5 = vadd.f32 1.0, %v156_v3  ;;  %p400_p8 = scmp.ne.s32.totalorder %s619_s27, %s399_s5  ;;  %p681_p9 = scmp.ne.s32.totalorder %s676_s19, 0 }
  0x3d   : > { %s484_s9 = smov [#allocation5]  }
  0x3e   : > { %361 = vrsqrt.f32 %v157_v4  ;;  %p401_p11 = pnand %p400_p8, %p681_p9  ;;  %s403_s12 = sshll.u32 %s484_s9, 4  ;;  %s404_s12 = int_to_ptr.vmem [resolvable:$false] %s403_s12 }
  0x3f   : > { %363 = vrsqrt.f32 %v158_v5  ;;  %s405_s13 = scalar_lea.vmem %s404_s12, 512  ;;  %p406_p7 = scmp.lt.s32.totalorder %s619_s27, %s404_s12 }
  0x40   : > { %p402_p0 = pneg %p401_p11  ;;  %p407_p13 = scmp.lt.s32.totalorder %s405_s13, %s399_s5 }
  0x42   : > { %p408_p3 = por %p407_p13, %p406_p7 }
  0x44   : > { %p409_p6 = pnand %p408_p3, %p402_p0 }
  0x48   : > { %v362_v6 = vpop.eup %361 }
  0x49   : > { %v364_v7 = vpop.eup %363  ;;  %365 = vrsqrt.f32 %v362_v6  ;;  %vm163_vm0 = vcmp.eq.f32.partialorder %v362_v6, inf  ;;  %v166_v9 = vand.u32 2147483648, %v362_v6  ;;  %vm165_vm1 = vcmp.eq.f32.partialorder %v362_v6, 0.0 }
  0x4a   : > { %367 = vrsqrt.f32 %v364_v7  ;;  %vm170_vm2 = vcmp.eq.f32.partialorder %v364_v7, inf  ;;  %v173_v12 = vand.u32 2147483648, %v364_v7  ;;  %vm172_vm3 = vcmp.eq.f32.partialorder %v364_v7, 0.0 }
  0x53   : > { %v366_v8 = vpop.eup %365 }
  0x54   : > { %v368_v10 = vpop.eup %367  ;;  %v162_v11 = vmul.f32 %v366_v8, %v362_v6 }
  0x55   : > { %v169_v13 = vmul.f32 %v368_v10, %v364_v7 }
  0x56   : > { %v164_v14 = vsel %vm163_vm0, %v362_v6, %v162_v11 }
  0x57   : > { %v167_v15 = vsel %vm165_vm1, %v166_v9, %v164_v14  ;;  %v171_v16 = vsel %vm170_vm2, %v364_v7, %v169_v13 }
  0x58   : > { %v175_v17 = vmul.f32 %v362_v6, %v167_v15  ;;  %v174_v18 = vsel %vm172_vm3, %v173_v12, %v171_v16 }
  0x59   : > { %v176_v19 = vmul.f32 %v364_v7, %v174_v18 }
  0x5a   : > { %v177_v20 = vmul.f32 %v175_v17, %v153_v0 }
  0x5b   : > { %v178_v21 = vmul.f32 %v176_v19, %v154_v1 }
  0x5c   : > { %179 = vst [vmem:[%s150_s18] sm:$0xff] %v177_v20 }
  0x5d   : > { %180 = vst [vmem:[%s150_s18 + $0x8] sm:$0xff] %v178_v21 }
  0x5e   : > { %412 = shalt.err (!%p409_p6)
}
  0x5f   : > { %s413_s15 = scalar_lea.hbm %s624_s3, 256  ;;  %s417_s22 = scalar_lea.hbm %s672_s1, 512 }
  0x60   : > { %p414_p4 = scmp.ne.s32.totalorder %s624_s3, %s413_s15  ;;  %p418_p1 = scmp.lt.u32.totalorder %s624_s3, %s672_s1 }
  0x61   : > { %p419_p2 = scmp.lt.u32.totalorder %s417_s22, %s413_s15  ;;  %p421_p8 = scmp.lt.u32.totalorder %s413_s15, %s624_s3 }
  0x62   : > { %p415_p10 = pnand %p414_p4, %p681_p9 }
  0x63   : > { %p420_p5 = por %p419_p2, %p418_p1 }
  0x64   : > { %p416_p12 = pneg %p415_p10 }
  0x65   : > { %p422_p11 = por %p421_p8, %p420_p5 }
  0x67   : > { %p423_p0 = pnand %p422_p11, %p416_p12 }
  0x69   : > { %426 = shalt.err (!%p423_p0)
}
  0x6a   : > { %301 = dma.vmem_to_hbm [thread:$0]  (%p681_p9), %s619_s27, 256, %s624_s3, %s182_s4  }
  0x6b PF: > { %s210_s25 = sand.u32 1, %s461_s6   ;;  %p682_p7 = scmp.ne.s32.totalorder %s677_s21, 0 }
  0x6c   : > { %p683_p13 = scmp.ge.s32.totalorder %s481_s11, 2  ;;  %s211_s26 = scalar_lea.sflag [#allocation4], %s210_s25 }
  0x6e   : > { %p308_p3 = pnand %p683_p13, %p682_p7 }
  0x70   : > { %456 = dma.done.wait (!%p308_p3), %s211_s26, 256  }
  0x71   : > { %458 = vsyncadd (!%p308_p3), %s211_s26, 4294967040  ;;  %s17_s11 = sadd.s32 1, %s481_s11   ;;  %s684_s6 = smov %s465_s7 }
  0x72   : > { %p14_p6 = scmp.ge.s32.totalorder %s17_s11, 4   ;;  %s685_s7 = smov %s469_s8 }
  0x73   : > { %s686_s8 = smov %s551_s20  ;;  %s687_s9 = smov %s477_s10 }
  0x74   : > { %s688_s10 = smov %s690_s14  ;;  %16 = sbr.rel (!%p14_p6) target bundleno = 6 (0x6), region = 69 }
  0x7b   :  { %216 = vsyncpa [#allocation3], 1 }
  0x7c   :  { %218 = vsyncpa [#allocation3 + $0x1], 1 }
  0x7d   :  { %219 = vsyncpa [#allocation4], 1 }
  0x7e   :  { %221 = vsyncpa [#allocation4 + $0x1], 1 }

</bundles_post_ra>
